<compile_context>
chip_gen: v7x
topology: tpu7x:2x2x1
jax: 0.10.0
libtpu: 0.0.40
codegen_flags: <defaults>
</compile_context>

<pallas_src>
import jax
import jax.numpy as jnp
from jax.experimental import pallas as pl
from jax.experimental.pallas import tpu as pltpu


def _round_up(x, m):
    return ((x + m - 1) // m) * m


def qnetwork_kernel(x_ref, w1_ref, b1_ref, w2_ref, b2_ref, w3_ref, b3_ref, o_ref):
    """One batch tile: x_ref (D, TB) bf16 -> o_ref (1, TB) f32 Q values."""
    # Layer 1: (H, D) @ (D, TB) on the MXU, f32 accumulate; bias + ReLU on VPU.
    h1 = jnp.dot(w1_ref[...], x_ref[...],
                 preferred_element_type=jnp.float32) + b1_ref[...]
    h1 = jnp.maximum(h1, 0.0)

    # Layer 2: (H, H) @ (H, TB).
    h2 = jnp.dot(w2_ref[...], h1.astype(w2_ref.dtype),
                 preferred_element_type=jnp.float32) + b2_ref[...]
    h2 = jnp.maximum(h2, 0.0)

    # Layer 3 (H -> 1): f32 multiply (VPU) + cross-sublane reduce (XLU, idle
    # otherwise) yields a lane-major (1, TB) block -> dense store, 4 B/row.
    q = jnp.sum(h2 * w3_ref[...], axis=0, keepdims=True) + b3_ref[...]
    o_ref[...] = q.astype(o_ref.dtype)


def _choose_batch_tile(batch, block_b):
    block_b = max(128, _round_up(block_b, 128))
    tb = min(block_b, _round_up(batch, 128))
    # Keep >= 2 grid steps whenever the batch allows it: the "parallel" batch
    # axis is what lets v7x's two TensorCores split the work.
    if batch > 128 and _round_up(batch, tb) == tb:
        tb = max(128, _round_up((batch + 1) // 2, 128))
    bp = _round_up(batch, tb)
    return tb, bp


def qnetwork_forward(state, action, params, *, block_b=1024):
    """Pallas-fused QNetwork forward. state (B, Ds), action (B, Da) -> (B, 1) f32."""
    w1, b1, w2, b2, w3, b3 = params
    B, Ds = state.shape
    Da = action.shape[1]
    D = Ds + Da
    H = w1.shape[1]

    # Kernel-ready parameters: (out_features, in_features) so every layer is a
    # standard-orientation matmul on the transposed activations.
    w1t = w1.T.astype(jnp.bfloat16)            # (H, D)  bf16
    b1c = b1.reshape(H, 1)                     # (H, 1)  f32
    w2t = w2.T.astype(jnp.bfloat16)            # (H, H)  bf16
    b2c = b2.reshape(H, 1)                     # (H, 1)  f32
    w3c = w3.reshape(H, 1)                     # (H, 1)  f32 (stays f32: VPU path)
    b3c = b3.reshape(1, 1)                     # (1, 1)  f32

    # Batch tiling + transposed / concatenated / bf16 input.
    TB, Bp = _choose_batch_tile(B, block_b)
    xt = jnp.concatenate([state, action], axis=1).T.astype(jnp.bfloat16)  # (D, B)
    if Bp != B:
        xt = jnp.pad(xt, ((0, 0), (0, Bp - B)))

    grid = (Bp // TB,)

    def full_spec(arr):
        return pl.BlockSpec(arr.shape, lambda i: (0, 0))

    flops = 2 * Bp * (D * H + H * H + H)
    bytes_accessed = (
        xt.size * 2                                             # bf16 activations in
        + (w1t.size + w2t.size) * 2                             # bf16 weights
        + (b1c.size + b2c.size + w3c.size + b3c.size) * 4       # f32 weights/biases
        + Bp * 4                                                # packed f32 output
    )

    out = pl.pallas_call(
        qnetwork_kernel,
        out_shape=jax.ShapeDtypeStruct((1, Bp), jnp.float32),
        grid=grid,
        in_specs=[
            pl.BlockSpec((D, TB), lambda i: (0, i)),            # x^T batch tile
            full_spec(w1t), full_spec(b1c),
            full_spec(w2t), full_spec(b2c),
            full_spec(w3c), full_spec(b3c),
        ],
        out_specs=pl.BlockSpec((1, TB), lambda i: (0, i)),      # lane-dense Q block
        compiler_params=pltpu.CompilerParams(
            dimension_semantics=("parallel",),
        ),
        cost_estimate=pl.CostEstimate(
            flops=flops, transcendentals=0, bytes_accessed=bytes_accessed),
    )(xt, w1t, b1c, w2t, b2c, w3c, b3c)

    # (1, Bp) lane-major Q values -> logical (B, 1).
    return out[0, :B].reshape(B, 1)


def init_qnetwork_params(key, input_dim, action_dim, hidden_units):
    """Xavier-uniform weights, zero biases (matches init_weights). Stored (in, out)."""
    D = input_dim + action_dim
    H = hidden_units

    def xavier(k, fan_in, fan_out):
        limit = jnp.sqrt(6.0 / (fan_in + fan_out))
        return jax.random.uniform(k, (fan_in, fan_out), jnp.float32, -limit, limit)

    k1, k2, k3 = jax.random.split(key, 3)
    w1 = xavier(k1, D, H)
    b1 = jnp.zeros((1, H), jnp.float32)
    w2 = xavier(k2, H, H)
    b2 = jnp.zeros((1, H), jnp.float32)
    w3 = xavier(k3, H, 1)
    b3 = jnp.zeros((1, 1), jnp.float32)
    return (w1, b1, w2, b2, w3, b3)


def reference_forward(state, action, params):
    """Pure-JAX f32 reference for the correctness check."""
    w1, b1, w2, b2, w3, b3 = params
    hi = jax.lax.Precision.HIGHEST
    x = jnp.concatenate([state, action], axis=1)
    h1 = jnp.maximum(jnp.dot(x, w1, precision=hi) + b1, 0.0)
    h2 = jnp.maximum(jnp.dot(h1, w2, precision=hi) + b2, 0.0)
    return jnp.dot(h2, w3, precision=hi) + b3


if __name__ == "__main__":
    # Small shapes consistent with the module.
    B, INPUT_DIM, ACTION_DIM, HIDDEN = 8, 16, 4, 128

    key = jax.random.PRNGKey(0)
    k_state, k_action, k_params, k_big = jax.random.split(key, 4)

    state = jax.random.normal(k_state, (B, INPUT_DIM), jnp.float32)
    action = jax.random.normal(k_action, (B, ACTION_DIM), jnp.float32)
    params = init_qnetwork_params(k_params, INPUT_DIM, ACTION_DIM, HIDDEN)

    # Small-batch check (single grid step).
    q = jax.block_until_ready(qnetwork_forward(state, action, params))
    q_ref = reference_forward(state, action, params)
    assert q.shape == (B, 1), q.shape
    # bf16 MXU inputs -> loosened tolerance vs the f32 reference.
    assert jnp.allclose(q, q_ref, atol=3e-2, rtol=3e-2), (q, q_ref)

    # Larger, non-tile-multiple batch: exercises the multi-step grid + padding path.
    B2 = 300
    kb_s, kb_a = jax.random.split(k_big)
    state2 = jax.random.normal(kb_s, (B2, INPUT_DIM), jnp.float32)
    action2 = jax.random.normal(kb_a, (B2, ACTION_DIM), jnp.float32)
    q2 = jax.block_until_ready(qnetwork_forward(state2, action2, params))
    q2_ref = reference_forward(state2, action2, params)
    assert q2.shape == (B2, 1), q2.shape
    assert jnp.allclose(q2, q2_ref, atol=3e-2, rtol=3e-2), (q2, q2_ref)

    print("KERNEL_OK")
</pallas_src>

<mosaic_0001>
module attributes {stable_mosaic.version = 11 : i64} {
  func.func @qnetwork_kernel(%arg0: i32, %arg1: memref<20x128xbf16, #tpu.memory_space<vmem>>, %arg2: memref<128x20xbf16, #tpu.memory_space<vmem>>, %arg3: memref<128x1xf32, #tpu.memory_space<vmem>>, %arg4: memref<128x128xbf16, #tpu.memory_space<vmem>>, %arg5: memref<128x1xf32, #tpu.memory_space<vmem>>, %arg6: memref<128x1xf32, #tpu.memory_space<vmem>>, %arg7: memref<1x1xf32, #tpu.memory_space<vmem>>, %arg8: memref<1x128xf32, #tpu.memory_space<vmem>>) attributes {dimension_semantics = [#tpu.dimension_semantics<parallel>], iteration_bounds = array<i64: 1>, scalar_prefetch = 0 : i64, scratch_operands = 0 : i64, tpu.core_type = #tpu.core_type<tc>, window_params = [{transform_indices = @transform_0, window_bounds = array<i64: 20, 128>}, {pipeline_mode = #tpu.pipeline_mode<synchronous>, transform_indices = @transform_1, window_bounds = array<i64: 128, 20>}, {pipeline_mode = #tpu.pipeline_mode<synchronous>, transform_indices = @transform_2, window_bounds = array<i64: 128, 1>}, {pipeline_mode = #tpu.pipeline_mode<synchronous>, transform_indices = @transform_3, window_bounds = array<i64: 128, 128>}, {pipeline_mode = #tpu.pipeline_mode<synchronous>, transform_indices = @transform_4, window_bounds = array<i64: 128, 1>}, {pipeline_mode = #tpu.pipeline_mode<synchronous>, transform_indices = @transform_5, window_bounds = array<i64: 128, 1>}, {pipeline_mode = #tpu.pipeline_mode<synchronous>, transform_indices = @transform_6, window_bounds = array<i64: 1, 1>}, {transform_indices = @transform_7, window_bounds = array<i64: 1, 128>}]} {
    %c0 = arith.constant 0 : index
    %c0_0 = arith.constant 0 : index
    %0 = vector.load %arg2[%c0, %c0_0] : memref<128x20xbf16, #tpu.memory_space<vmem>>, vector<128x20xbf16>
    %c0_1 = arith.constant 0 : index
    %c0_2 = arith.constant 0 : index
    %1 = vector.load %arg1[%c0_1, %c0_2] : memref<20x128xbf16, #tpu.memory_space<vmem>>, vector<20x128xbf16>
    %cst = arith.constant dense<0.000000e+00> : vector<128x128xf32>
    %2 = tpu.matmul %0, %1, %cst {dimension_numbers = #tpu.dot_dimension_numbers<[1], [0], [0], [1], [0, 0, 1, 1], [], []>} : vector<128x20xbf16>, vector<20x128xbf16>, vector<128x128xf32> -> vector<128x128xf32>
    %c0_3 = arith.constant 0 : index
    %c0_4 = arith.constant 0 : index
    %3 = vector.load %arg3[%c0_3, %c0_4] : memref<128x1xf32, #tpu.memory_space<vmem>>, vector<128x1xf32>
    %4 = vector.broadcast %3 : vector<128x1xf32> to vector<128x128xf32>
    %5 = arith.addf %2, %4 : vector<128x128xf32>
    %cst_5 = arith.constant 0.000000e+00 : f32
    %6 = vector.broadcast %cst_5 : f32 to vector<128x128xf32>
    %7 = arith.maximumf %5, %6 : vector<128x128xf32>
    %c0_6 = arith.constant 0 : index
    %c0_7 = arith.constant 0 : index
    %8 = vector.load %arg4[%c0_6, %c0_7] : memref<128x128xbf16, #tpu.memory_space<vmem>>, vector<128x128xbf16>
    %9 = arith.truncf %7 : vector<128x128xf32> to vector<128x128xbf16>
    %cst_8 = arith.constant dense<0.000000e+00> : vector<128x128xf32>
    %10 = tpu.matmul %8, %9, %cst_8 {dimension_numbers = #tpu.dot_dimension_numbers<[1], [0], [0], [1], [0, 0, 1, 1], [], []>} : vector<128x128xbf16>, vector<128x128xbf16>, vector<128x128xf32> -> vector<128x128xf32>
    %c0_9 = arith.constant 0 : index
    %c0_10 = arith.constant 0 : index
    %11 = vector.load %arg5[%c0_9, %c0_10] : memref<128x1xf32, #tpu.memory_space<vmem>>, vector<128x1xf32>
    %12 = vector.broadcast %11 : vector<128x1xf32> to vector<128x128xf32>
    %13 = arith.addf %10, %12 : vector<128x128xf32>
    %cst_11 = arith.constant 0.000000e+00 : f32
    %14 = vector.broadcast %cst_11 : f32 to vector<128x128xf32>
    %15 = arith.maximumf %13, %14 : vector<128x128xf32>
    %c0_12 = arith.constant 0 : index
    %c0_13 = arith.constant 0 : index
    %16 = vector.load %arg6[%c0_12, %c0_13] : memref<128x1xf32, #tpu.memory_space<vmem>>, vector<128x1xf32>
    %17 = vector.broadcast %16 : vector<128x1xf32> to vector<128x128xf32>
    %18 = arith.mulf %15, %17 : vector<128x128xf32>
    %cst_14 = arith.constant dense<0.000000e+00> : vector<128xf32>
    %19 = vector.multi_reduction <add>, %18, %cst_14 [0] : vector<128x128xf32> to vector<128xf32>
    %20 = vector.shape_cast %19 : vector<128xf32> to vector<1x128xf32>
    %c0_15 = arith.constant 0 : index
    %c0_16 = arith.constant 0 : index
    %21 = vector.load %arg7[%c0_15, %c0_16] : memref<1x1xf32, #tpu.memory_space<vmem>>, vector<1x1xf32>
    %22 = vector.broadcast %21 : vector<1x1xf32> to vector<1x128xf32>
    %23 = arith.addf %20, %22 : vector<1x128xf32>
    %c0_17 = arith.constant 0 : index
    %c0_18 = arith.constant 0 : index
    %24 = vector.load %arg8[%c0_17, %c0_18] : memref<1x128xf32, #tpu.memory_space<vmem>>, vector<1x128xf32>
    tpu.vector_store %arg8[%c0_17, %c0_18], %23 {strides = array<i32>} : memref<1x128xf32, #tpu.memory_space<vmem>>, vector<1x128xf32>,
    return
  }
  func.func @transform_0(%arg0: i32) -> (i32, i32) {
    %c0_i32 = arith.constant 0 : i32
    %c0_i32_0 = arith.constant 0 : i32
    return %c0_i32, %arg0 : i32, i32
  }
  func.func @transform_1(%arg0: i32) -> (i32, i32) {
    %c0_i32 = arith.constant 0 : i32
    %c0_i32_0 = arith.constant 0 : i32
    %c0_i32_1 = arith.constant 0 : i32
    return %c0_i32, %c0_i32_0 : i32, i32
  }
  func.func @transform_2(%arg0: i32) -> (i32, i32) {
    %c0_i32 = arith.constant 0 : i32
    %c0_i32_0 = arith.constant 0 : i32
    %c0_i32_1 = arith.constant 0 : i32
    return %c0_i32, %c0_i32_0 : i32, i32
  }
  func.func @transform_3(%arg0: i32) -> (i32, i32) {
    %c0_i32 = arith.constant 0 : i32
    %c0_i32_0 = arith.constant 0 : i32
    %c0_i32_1 = arith.constant 0 : i32
    return %c0_i32, %c0_i32_0 : i32, i32
  }
  func.func @transform_4(%arg0: i32) -> (i32, i32) {
    %c0_i32 = arith.constant 0 : i32
    %c0_i32_0 = arith.constant 0 : i32
    %c0_i32_1 = arith.constant 0 : i32
    return %c0_i32, %c0_i32_0 : i32, i32
  }
  func.func @transform_5(%arg0: i32) -> (i32, i32) {
    %c0_i32 = arith.constant 0 : i32
    %c0_i32_0 = arith.constant 0 : i32
    %c0_i32_1 = arith.constant 0 : i32
    return %c0_i32, %c0_i32_0 : i32, i32
  }
  func.func @transform_6(%arg0: i32) -> (i32, i32) {
    %c0_i32 = arith.constant 0 : i32
    %c0_i32_0 = arith.constant 0 : i32
    %c0_i32_1 = arith.constant 0 : i32
    return %c0_i32, %c0_i32_0 : i32, i32
  }
  func.func @transform_7(%arg0: i32) -> (i32, i32) {
    %c0_i32 = arith.constant 0 : i32
    %c0_i32_0 = arith.constant 0 : i32
    return %c0_i32, %arg0 : i32, i32
  }
}

</mosaic_0001>

<bundles_post_ra>
// kernel: tpu_custom_call.1
= control target key start
LH: loop header
LB: loop body
LE: loop exit
PB: predicated region body
PF: predicated region fallthrough
CT: control target
= control target key end

     0   :  { %s1206_s0 = inlined_call_operand.vmem [shape: bf16[20,128], index: 0, kind: input, shape index: {}]   ;;  %s1207_s1 = inlined_call_operand.vmem [shape: bf16[128,20], index: 1, kind: input, shape index: {}]   ;;  %s1208_s2 = inlined_call_operand.vmem [shape: f32[128,1], index: 2, kind: input, shape index: {}]   ;;  %s1209_s3 = inlined_call_operand.vmem [shape: bf16[128,128], index: 3, kind: input, shape index: {}]   ;;  %s1210_s4 = inlined_call_operand.vmem [shape: f32[128,1], index: 4, kind: input, shape index: {}]   ;;  %s1211_s5 = inlined_call_operand.vmem [shape: f32[128,1], index: 5, kind: input, shape index: {}]   ;;  %s1212_s6 = inlined_call_operand.<no memory space> [shape: f32[1,1], index: 6, kind: input, shape index: {}]   ;;  %s1213_s7 = inlined_call_operand.hbm [shape: f32[1,128], index: 7, kind: output, shape index: {}]  }
   0x1   :  { %v12_v0 = vstv %s1212_s6 }
   0x2   :  { %13 = vst [vmem:[#allocation2] sm:$0x1] %v12_v0 }
   0x3   :  { %v49_v1 = vld [vmem:[%s1208_s2] sm:$0xff]  ;;  %v943_v2 = vmov 0   ;;  %v51_v4 = vld [vmem:[%s1208_s2 + $0x10] sm:$0xff]  ;;  %v50_v5 = vld [vmem:[%s1208_s2 + $0x8] sm:$0xff]  ;;  %vm219_vm0 = vcmask 1041408   ;;  %vm194_vm1 = vcmask 162816  }
   0x4   :  { %899 = vset.pattern.permute.xlu0 %v943_v2  ;;  %v901_v3 = vld [vmem:[%s1206_s0] sm:$0xff]   ;;  %900 = vset.pattern.permute.xlu1 %v943_v2  ;;  %v902_v6 = vld [vmem:[%s1206_s0 + $0x8] ss:$0 sps:$4 sm:$0x33]   ;;  %v52_v7 = vld [vmem:[%s1208_s2 + $0x18] sm:$0xff] }
   0x5   :  { %67 = vperm.xlu0 %899, %v49_v1   ;;  %77 = vperm.xlu1 %900, %v51_v4   ;;  %v903_v8 = vld [vmem:[%s1207_s1] sm:$0xff]   ;;  %v221_v9 = vsel %vm219_vm0, %v902_v6, 0  ;;  %v904_v11 = vld [vmem:[%s1207_s1 + $0x8] sm:$0xff]   ;;  %v905_v13 = vld [vmem:[%s1207_s1 + $0x10] sm:$0xff]  }
   0x6   :  { %828 = vmatprep.subr.bf16.mxu0 %v901_v3  ;;  %v53_v10 = vld [vmem:[%s1208_s2 + $0x20] sm:$0xff]  ;;  %832 = vmatprep.mubr.msk.bf16.mxu0 %vm194_vm1, %v903_v8  ;;  %v54_v12 = vld [vmem:[%s1208_s2 + $0x28] sm:$0xff]  ;;  %v55_v14 = vld [vmem:[%s1208_s2 + $0x30] sm:$0xff] }
   0x7   :  { %829 = vmatpush3.bf16.msra.mxu0 %v901_v3  ;;  %v56_v15 = vld [vmem:[%s1208_s2 + $0x38] sm:$0xff]  ;;  %v57_v16 = vld [vmem:[%s1208_s2 + $0x40] sm:$0xff]  ;;  %v58_v18 = vld [vmem:[%s1208_s2 + $0x48] sm:$0xff] }
   0x8   :  { %896 = vmatprep.subr.msk.bf16.mxu0 %vm219_vm0, %v902_v6  ;;  %v906_v17 = vld [vmem:[%s1207_s1 + $0x18] sm:$0xff]   ;;  %v907_v19 = vld [vmem:[%s1207_s1 + $0x20] sm:$0xff]   ;;  %v59_v20 = vld [vmem:[%s1208_s2 + $0x50] sm:$0xff] }
   0x9   :  { %72 = vperm.xlu0 %899, %v50_v5   ;;  %82 = vperm.xlu1 %900, %v52_v7   ;;  %v60_v21 = vld [vmem:[%s1208_s2 + $0x58] sm:$0xff]  ;;  %v61_v22 = vld [vmem:[%s1208_s2 + $0x60] sm:$0xff]  ;;  %v908_v23 = vld [vmem:[%s1207_s1 + $0x28] sm:$0xff]  }
   0xa   :  { %v62_v24 = vld [vmem:[%s1208_s2 + $0x68] sm:$0xff]  ;;  %v909_v25 = vld [vmem:[%s1207_s1 + $0x30] sm:$0xff]   ;;  %v64_v27 = vld [vmem:[%s1208_s2 + $0x78] sm:$0xff] }
   0xb   :  { %831 = vmatpush3.bf16.msra.mxu0 %v221_v9  ;;  %v63_v26 = vld [vmem:[%s1208_s2 + $0x70] sm:$0xff]  ;;  %v360_v28 = vld [vmem:[%s1210_s4] sm:$0xff]  ;;  %v910_v29 = vld [vmem:[%s1207_s1 + $0x38] sm:$0xff]  }
   0xc   :  { %v361_v30 = vld [vmem:[%s1210_s4 + $0x8] sm:$0xff] }
   0xd   :  { %87 = vperm.xlu0 %899, %v53_v10   ;;  %92 = vperm.xlu1 %900, %v54_v12  }
   0xe   :  { %833 = vmatmul.mubr.msk.bf16.vlgmr.msra.gmra.mrb[0].mxu0 %vm194_vm1, %v904_v11 }
   0xf   :  { %836 = vmatprep.mubr.msk.bf16.mxu0 %vm194_vm1, %v905_v13 }
  0x11   :  { %97 = vperm.xlu0 %899, %v55_v14   ;;  %102 = vperm.xlu1 %900, %v56_v15  }
  0x15   :  { %107 = vperm.xlu0 %899, %v57_v16   ;;  %112 = vperm.xlu1 %900, %v58_v18  }
  0x16   :  { %837 = vmatmul.mubr.msk.bf16.gmra.mrb[4].mxu0 %vm194_vm1, %v906_v17 }
  0x17   :  { %840 = vmatprep.mubr.msk.bf16.mxu0 %vm194_vm1, %v907_v19 }
  0x19   :  { %117 = vperm.xlu0 %899, %v59_v20   ;;  %122 = vperm.xlu1 %900, %v60_v21  }
  0x1d   :  { %127 = vperm.xlu0 %899, %v61_v22   ;;  %132 = vperm.xlu1 %900, %v62_v24  }
  0x1e   :  { %841 = vmatmul.mubr.msk.bf16.gmra.mrb[8].mxu0 %vm194_vm1, %v908_v23 }
  0x1f   :  { %844 = vmatprep.mubr.msk.bf16.mxu0 %vm194_vm1, %v909_v25 }
  0x21   :  { %137 = vperm.xlu0 %899, %v63_v26   ;;  %142 = vperm.xlu1 %900, %v64_v27  }
  0x22   :  { %14 = vsyncpa [#allocation4], 0  ;;  %v362_v31 = vld [vmem:[%s1210_s4 + $0x10] sm:$0xff]  ;;  %v363_v32 = vld [vmem:[%s1210_s4 + $0x18] sm:$0xff] }
  0x23   :  { %v364_v33 = vld [vmem:[%s1210_s4 + $0x20] sm:$0xff]  ;;  %v618_v35 = vld [vmem:[%s1211_s5 + $0x8] sm:$0xff]  ;;  %v619_v36 = vld [vmem:[%s1211_s5 + $0x10] sm:$0xff] }
  0x24   :  { %v617_v34 = vld [vmem:[%s1211_s5] sm:$0xff]  ;;  %v365_v37 = vld [vmem:[%s1210_s4 + $0x28] sm:$0xff]  ;;  %v620_v38 = vld [vmem:[%s1211_s5 + $0x18] sm:$0xff] }
  0x25   :  { %378 = vperm.xlu0 %899, %v360_v28   ;;  %383 = vperm.xlu1 %900, %v361_v30   ;;  %v366_v39 = vld [vmem:[%s1210_s4 + $0x30] sm:$0xff]  ;;  %v621_v40 = vld [vmem:[%s1211_s5 + $0x20] sm:$0xff]  ;;  %v367_v41 = vld [vmem:[%s1210_s4 + $0x38] sm:$0xff] }
  0x26   :  { %845 = vmatmul.mubr.msk.bf16.gmra.mrb[12].mxu0 %vm194_vm1, %v910_v29  ;;  %v622_v42 = vld [vmem:[%s1211_s5 + $0x28] sm:$0xff]  ;;  %v368_v43 = vld [vmem:[%s1210_s4 + $0x40] sm:$0xff]  ;;  %v623_v44 = vld [vmem:[%s1211_s5 + $0x30] sm:$0xff] }
  0x27   :  { %v369_v45 = vld [vmem:[%s1210_s4 + $0x48] sm:$0xff]  ;;  %v624_v46 = vld [vmem:[%s1211_s5 + $0x38] sm:$0xff]  ;;  %v370_v47 = vld [vmem:[%s1210_s4 + $0x50] sm:$0xff] }
  0x28   :  { %v625_v48 = vld [vmem:[%s1211_s5 + $0x40] sm:$0xff]  ;;  %v371_v49 = vld [vmem:[%s1210_s4 + $0x58] sm:$0xff]  ;;  %v626_v50 = vld [vmem:[%s1211_s5 + $0x48] sm:$0xff] }
  0x29   :  { %388 = vperm.xlu0 %899, %v362_v31   ;;  %393 = vperm.xlu1 %900, %v363_v32   ;;  %v372_v51 = vld [vmem:[%s1210_s4 + $0x60] sm:$0xff]  ;;  %v627_v52 = vld [vmem:[%s1211_s5 + $0x50] sm:$0xff]  ;;  %v373_v53 = vld [vmem:[%s1210_s4 + $0x68] sm:$0xff] }
  0x2a   :  { %v628_v54 = vld [vmem:[%s1211_s5 + $0x58] sm:$0xff]  ;;  %v374_v55 = vld [vmem:[%s1210_s4 + $0x70] sm:$0xff]  ;;  %v629_v56 = vld [vmem:[%s1211_s5 + $0x60] sm:$0xff] }
  0x2b   :  { %v375_v57 = vld [vmem:[%s1210_s4 + $0x78] sm:$0xff]  ;;  %v630_v58 = vld [vmem:[%s1211_s5 + $0x68] sm:$0xff]  ;;  %v631_v59 = vld [vmem:[%s1211_s5 + $0x70] sm:$0xff] }
  0x2c   :  { %v632_v60 = vld [vmem:[%s1211_s5 + $0x78] sm:$0xff]  ;;  %v750_v61 = vld [vmem:[#allocation2] sm:$0x1]  ;;  %v912_v63 = vld [vmem:[%s1209_s3 + $0x10] sm:$0xff]  }
  0x2d   :  { %398 = vperm.xlu0 %899, %v364_v33   ;;  %635 = vperm.xlu1 %900, %v617_v34   ;;  %v911_v62 = vld [vmem:[%s1209_s3] sm:$0xff]  }
  0x2e   :  { %864 = vmatprep.mubr.bf16.mxu0 %v911_v62  ;;  %868 = vmatprep.mubr.bf16.mxu1 %v912_v63 }
  0x31   :  { %640 = vperm.xlu0 %899, %v618_v35   ;;  %645 = vperm.xlu1 %900, %v619_v36  }
  0x35   :  { %403 = vperm.xlu0 %899, %v365_v37   ;;  %650 = vperm.xlu1 %900, %v620_v38  }
  0x39   :  { %408 = vperm.xlu0 %899, %v366_v39   ;;  %655 = vperm.xlu1 %900, %v621_v40  }
  0x3d   :  { %413 = vperm.xlu0 %899, %v367_v41   ;;  %660 = vperm.xlu1 %900, %v622_v42  }
  0x41   :  { %418 = vperm.xlu0 %899, %v368_v43   ;;  %665 = vperm.xlu1 %900, %v623_v44  }
  0x45   :  { %423 = vperm.xlu0 %899, %v369_v45   ;;  %670 = vperm.xlu1 %900, %v624_v46  }
  0x49   :  { %428 = vperm.xlu0 %899, %v370_v47   ;;  %675 = vperm.xlu1 %900, %v625_v48  }
  0x4d   :  { %433 = vperm.xlu0 %899, %v371_v49   ;;  %680 = vperm.xlu1 %900, %v626_v50  }
  0x51   :  { %438 = vperm.xlu0 %899, %v372_v51   ;;  %685 = vperm.xlu1 %900, %v627_v52  }
  0x55   :  { %443 = vperm.xlu0 %899, %v373_v53   ;;  %690 = vperm.xlu1 %900, %v628_v54  }
  0x59   :  { %448 = vperm.xlu0 %899, %v374_v55   ;;  %695 = vperm.xlu1 %900, %v629_v56  }
  0x5d   :  { %453 = vperm.xlu0 %899, %v375_v57   ;;  %700 = vperm.xlu1 %900, %v630_v58  }
  0x61   :  { %705 = vperm.xlu0 %899, %v631_v59   ;;  %710 = vperm.xlu1 %900, %v632_v60  }
  0x65   :  { %753 = vperm.xlu0 %899, %v750_v61  }
  0x84   :  { %v68_v0 = vpop.permute.xlu0 %67  ;;  %v78_v1 = vpop.permute.xlu1 %77 }
  0x88   :  { %v73_v2 = vpop.permute.xlu0 %72  ;;  %v83_v3 = vpop.permute.xlu1 %82 }
  0x8c   :  { %v88_v4 = vpop.permute.xlu0 %87  ;;  %v93_v5 = vpop.permute.xlu1 %92 }
  0x90   :  { %v98_v6 = vpop.permute.xlu0 %97  ;;  %v103_v10 = vpop.permute.xlu1 %102 }
  0x94   :  { %v108_v18 = vpop.permute.xlu0 %107  ;;  %v113_v22 = vpop.permute.xlu1 %112 }
  0x98   :  { %v118_v31 = vpop.permute.xlu0 %117  ;;  %v123_v35 = vpop.permute.xlu1 %122 }
  0x9c   :  { %v128_v43 = vpop.permute.xlu0 %127  ;;  %v133_v48 = vpop.permute.xlu1 %132 }
  0xa0   :  { %v138_v55 = vpop.permute.xlu0 %137  ;;  %v143_v60 = vpop.permute.xlu1 %142 }
  0xe1   :  { %v834_v7 = vpop.f32.mrb[0].mxu0 }
  0xe2   :  { %v266_v8 = vadd.f32 %v834_v7, %v78_v1  ;;  %v257_v9 = vpop.f32.mrb[1].mxu0 }
  0xe3   :  { %v258_v11 = vadd.f32 %v257_v9, %v68_v0  ;;  %v835_v12 = vpop.f32.mrb[2].mxu0  ;;  %v914_v9 = vld [vmem:[%s1209_s3 + $0x18] sm:$0xff]  }
  0xe4   :  { %v269_v13 = vadd.f32 %v835_v12, %v83_v3  ;;  %v260_v14 = vpop.f32.mrb[3].mxu0  ;;  %v322_v16 = vmax.f32 %v266_v8, 0.0  ;;  %v913_v8 = vld [vmem:[%s1209_s3 + $0x8] sm:$0xff]   ;;  %v917_v12 = vld [vmem:[%s1209_s3 + $0x30] sm:$0xff]  }
  0xe5   :  { %v261_v15 = vadd.f32 %v260_v14, %v73_v2  ;;  %v320_v19 = vmax.f32 %v258_v11, 0.0  ;;  %v916_v11 = vld [vmem:[%s1209_s3 + $0x28] sm:$0xff]   ;;  %v379_v14 = vpop.permute.xlu0 %378 }
  0xe6   :  { %v323_v17 = vmax.f32 %v269_v13, 0.0  ;;  %v918_v13 = vld [vmem:[%s1209_s3 + $0x38] sm:$0xff]  }
  0xe7   :  { %v321_v20 = vmax.f32 %v261_v15, 0.0  ;;  %v384_v15 = vpop.permute.xlu1 %383 }
  0xe8   :  { %v353_v21 = vpack.c.bf16 %v323_v17, %v322_v16 }
  0xe9   :  { %v352_v23 = vpack.c.bf16 %v321_v20, %v320_v19  ;;  %v838_v24 = vpop.f32.mrb[4].mxu0  ;;  %v389_v16 = vpop.permute.xlu0 %388 }
  0xea   :  { %v282_v25 = vadd.f32 %v838_v24, %v98_v6  ;;  %v273_v26 = vpop.f32.mrb[5].mxu0 }
  0xeb   :  { %v274_v27 = vadd.f32 %v273_v26, %v88_v4  ;;  %v839_v28 = vpop.f32.mrb[6].mxu0  ;;  %848 = vmatprep.subr.bf16.mxu0 %v352_v23  ;;  %880 = vmatprep.subr.bf16.mxu1 %v352_v23  ;;  %v394_v17 = vpop.permute.xlu1 %393 }
  0xec   :  { %v285_v29 = vadd.f32 %v839_v28, %v103_v10  ;;  %v276_v30 = vpop.f32.mrb[7].mxu0  ;;  %849 = vmatpush3.bf16.msra.mxu0 %v352_v23  ;;  %888 = vmatpush3.bf16.msra.mxu1 %v352_v23  ;;  %v326_v33 = vmax.f32 %v282_v25, 0.0  ;;  %v915_v10 = vld [vmem:[%s1209_s3 + $0x20] sm:$0xff]   ;;  %s944_s3 = smov [#allocation3]  }
  0xed   :  { %v277_v32 = vadd.f32 %v276_v30, %v93_v5  ;;  %850 = vmatprep.subr.bf16.mxu0 %v353_v21  ;;  %881 = vmatprep.subr.bf16.mxu1 %v353_v21  ;;  %v324_v36 = vmax.f32 %v274_v27, 0.0  ;;  %s768_s25 = sshll.u32 %s944_s3, 4  ;;  %s769_s25 = int_to_ptr.vmem [resolvable:$true] %s768_s25 }
  0xee   :  { %v327_v34 = vmax.f32 %v285_v29, 0.0  ;;  %s919_s26 = scalar_lea.vmem %s769_s25, 16  ;;  %s923_s27 = scalar_lea.vmem %s769_s25, 32 }
  0xef   :  { %v325_v37 = vmax.f32 %v277_v32, 0.0  ;;  %v636_v19 = vpop.permute.xlu1 %635  ;;  %p920_p0 = scmp.ne.s32.totalorder %s769_s25, %s919_s26  ;;  %p924_p1 = scmp.lt.s32.totalorder %s769_s25, %s769_s25 }
  0xf0   :  { %v355_v38 = vpack.c.bf16 %v327_v34, %v326_v33  ;;  %851 = vmatpush3.bf16.msra.mxu0 %v353_v21  ;;  %889 = vmatpush3.bf16.msra.mxu1 %v353_v21  ;;  %p925_p2 = scmp.lt.s32.totalorder %s923_s27, %s919_s26 }
  0xf1   :  { %v354_v39 = vpack.c.bf16 %v325_v37, %v324_v36  ;;  %v842_v40 = vpop.f32.mrb[8].mxu0 }
  0xf2   :  { %v298_v41 = vadd.f32 %v842_v40, %v118_v31  ;;  %v289_v42 = vpop.f32.mrb[9].mxu0  ;;  %p926_p3 = por %p925_p2, %p924_p1 }
  0xf3   :  { %v290_v44 = vadd.f32 %v289_v42, %v108_v18  ;;  %v843_v45 = vpop.f32.mrb[10].mxu0  ;;  %852 = vmatprep.subr.bf16.mxu0 %v354_v39  ;;  %882 = vmatprep.subr.bf16.mxu1 %v354_v39  ;;  %v399_v18 = vpop.permute.xlu0 %398 }
  0xf4   :  { %v301_v46 = vadd.f32 %v843_v45, %v123_v35  ;;  %v292_v47 = vpop.f32.mrb[11].mxu0  ;;  %853 = vmatpush3.bf16.msra.mxu0 %v354_v39  ;;  %890 = vmatpush3.bf16.msra.mxu1 %v354_v39  ;;  %v330_v50 = vmax.f32 %v298_v41, 0.0  ;;  %v646_v21 = vpop.permute.xlu1 %645  ;;  %p927_p4 = pnand %p926_p3, %p920_p0 }
  0xf5   :  { %v293_v49 = vadd.f32 %v292_v47, %v113_v22  ;;  %854 = vmatprep.subr.bf16.mxu0 %v355_v38  ;;  %883 = vmatprep.subr.bf16.mxu1 %v355_v38  ;;  %v328_v52 = vmax.f32 %v290_v44, 0.0 }
  0xf6   :  { %v331_v51 = vmax.f32 %v301_v46, 0.0 }
  0xf7   :  { %v329_v53 = vmax.f32 %v293_v49, 0.0  ;;  %v641_v20 = vpop.permute.xlu0 %640 }
  0xf8   :  { %v357_v54 = vpack.c.bf16 %v331_v51, %v330_v50  ;;  %855 = vmatpush3.bf16.msra.mxu0 %v355_v38  ;;  %891 = vmatpush3.bf16.msra.mxu1 %v355_v38  ;;  %v651_v23 = vpop.permute.xlu1 %650 }
  0xf9   :  { %v356_v56 = vpack.c.bf16 %v329_v53, %v328_v52  ;;  %v846_v57 = vpop.f32.mrb[12].mxu0 }
  0xfa   :  { %v314_v58 = vadd.f32 %v846_v57, %v138_v55  ;;  %v305_v59 = vpop.f32.mrb[13].mxu0 }
  0xfb   :  { %v306_v61 = vadd.f32 %v305_v59, %v128_v43  ;;  %v847_v62 = vpop.f32.mrb[14].mxu0  ;;  %856 = vmatprep.subr.bf16.mxu0 %v356_v56  ;;  %884 = vmatprep.subr.bf16.mxu1 %v356_v56  ;;  %v404_v22 = vpop.permute.xlu0 %403 }
  0xfc   :  { %v317_v63 = vadd.f32 %v847_v62, %v143_v60  ;;  %v308_v0 = vpop.f32.mrb[15].mxu0  ;;  %857 = vmatpush3.bf16.msra.mxu0 %v356_v56  ;;  %892 = vmatpush3.bf16.msra.mxu1 %v356_v56  ;;  %v334_v2 = vmax.f32 %v314_v58, 0.0  ;;  %v656_v25 = vpop.permute.xlu1 %655 }
  0xfd   :  { %v309_v1 = vadd.f32 %v308_v0, %v133_v48  ;;  %858 = vmatprep.subr.bf16.mxu0 %v357_v54  ;;  %885 = vmatprep.subr.bf16.mxu1 %v357_v54  ;;  %v332_v4 = vmax.f32 %v306_v61, 0.0 }
  0xfe   :  { %v335_v3 = vmax.f32 %v317_v63, 0.0 }
  0xff   :  { %v333_v5 = vmax.f32 %v309_v1, 0.0  ;;  %v409_v24 = vpop.permute.xlu0 %408 }
 0x100   :  { %v359_v6 = vpack.c.bf16 %v335_v3, %v334_v2  ;;  %859 = vmatpush3.bf16.msra.mxu0 %v357_v54  ;;  %893 = vmatpush3.bf16.msra.mxu1 %v357_v54  ;;  %v661_v27 = vpop.permute.xlu1 %660 }
 0x101   :  { %v358_v7 = vpack.c.bf16 %v333_v5, %v332_v4 }
 0x103   :  { %860 = vmatprep.subr.bf16.mxu0 %v358_v7  ;;  %886 = vmatprep.subr.bf16.mxu1 %v358_v7  ;;  %v414_v26 = vpop.permute.xlu0 %413 }
 0x104   :  { %861 = vmatpush3.bf16.msra.mxu0 %v358_v7  ;;  %894 = vmatpush3.bf16.msra.mxu1 %v358_v7  ;;  %v666_v29 = vpop.permute.xlu1 %665 }
 0x105   :  { %862 = vmatprep.subr.bf16.mxu0 %v359_v6  ;;  %887 = vmatprep.subr.bf16.mxu1 %v359_v6 }
 0x107   :  { %v419_v28 = vpop.permute.xlu0 %418 }
 0x108   :  { %863 = vmatpush3.bf16.msra.mxu0 %v359_v6  ;;  %895 = vmatpush3.bf16.msra.mxu1 %v359_v6  ;;  %v671_v31 = vpop.permute.xlu1 %670 }
 0x10b   :  { %865 = vmatmul.mubr.bf16.vlgmr.msra.gmra.mrb[16].mxu0 %v913_v8  ;;  %869 = vmatmul.mubr.bf16.vlgmr.msra.gmra.mrb[0].mxu1 %v914_v9  ;;  %v424_v30 = vpop.permute.xlu0 %423 }
 0x10c   :  { %872 = vmatprep.mubr.bf16.mxu1 %v915_v10  ;;  %v676_v33 = vpop.permute.xlu1 %675 }
 0x10f   :  { %v429_v32 = vpop.permute.xlu0 %428 }
 0x110   :  { %v681_v48 = vpop.permute.xlu1 %680 }
 0x113   :  { %873 = vmatmul.mubr.bf16.gmra.mrb[4].mxu1 %v916_v11  ;;  %v434_v34 = vpop.permute.xlu0 %433 }
 0x114   :  { %876 = vmatprep.mubr.bf16.mxu1 %v917_v12  ;;  %v686_v0 = vpop.permute.xlu1 %685 }
 0x117   :  { %v439_v57 = vpop.permute.xlu0 %438 }
 0x11b   :  { %877 = vmatmul.mubr.bf16.gmra.mrb[8].mxu1 %v918_v13  ;;  %v444_v10 = vpop.permute.xlu0 %443 }
 0x1de   :  { %v866_v35 = vpop.f32.mrb[16].mxu0  ;;  %v870_v36 = vpop.f32.mrb[0].mxu1 }
 0x1df   :  { %v538_v37 = vpop.f32.mrb[17].mxu0  ;;  %v554_v38 = vpop.f32.mrb[1].mxu1  ;;  %v547_v39 = vadd.f32 %v866_v35, %v389_v16  ;;  %v563_v60 = vadd.f32 %v870_v36, %v409_v24 }
 0x1e0   :  { %v539_v40 = vadd.f32 %v538_v37, %v379_v14  ;;  %v867_v41 = vpop.f32.mrb[18].mxu0  ;;  %v871_v42 = vpop.f32.mrb[2].mxu1  ;;  %v555_v50 = vadd.f32 %v554_v38, %v399_v18 }
 0x1e1   :  { %v541_v43 = vpop.f32.mrb[19].mxu0  ;;  %v557_v44 = vpop.f32.mrb[3].mxu1  ;;  %v550_v46 = vadd.f32 %v867_v41, %v394_v17  ;;  %v603_v49 = vmax.f32 %v547_v39, 0.0  ;;  %v566_v3 = vadd.f32 %v871_v42, %v414_v26  ;;  %v607_v6 = vmax.f32 %v563_v60, 0.0 }
 0x1e2   :  { %v601_v45 = vmax.f32 %v539_v40, 0.0  ;;  %v542_v47 = vadd.f32 %v541_v43, %v384_v15  ;;  %v558_v55 = vadd.f32 %v557_v44, %v404_v22  ;;  %v605_v61 = vmax.f32 %v555_v50, 0.0  ;;  %v691_v16 = vpop.permute.xlu1 %690  ;;  %v449_v36 = vpop.permute.xlu0 %448 }
 0x1e3   :  { %v604_v53 = vmax.f32 %v550_v46, 0.0  ;;  %v715_v59 = vmul.f32 %v646_v21, %v603_v49  ;;  %v608_v11 = vmax.f32 %v566_v3, 0.0  ;;  %v719_v18 = vmul.f32 %v666_v29, %v607_v6 }
 0x1e4   :  { %v602_v51 = vmax.f32 %v542_v47, 0.0  ;;  %v713_v52 = vmul.f32 %v636_v19, %v601_v45  ;;  %v606_v5 = vmax.f32 %v558_v55, 0.0  ;;  %v717_v7 = vmul.f32 %v656_v25, %v605_v61 }
 0x1e5   :  { %v716_v2 = vmul.f32 %v651_v23, %v604_v53  ;;  %v720_v24 = vmul.f32 %v671_v31, %v608_v11  ;;  %v756_v60 = vlaneseq }
 0x1e6   :  { %v714_v54 = vmul.f32 %v641_v20, %v602_v51  ;;  %v874_v56 = vpop.f32.mrb[4].mxu1  ;;  %v718_v12 = vmul.f32 %v661_v27, %v606_v5  ;;  %v696_v39 = vpop.permute.xlu1 %695 }
 0x1e7   :  { %v570_v58 = vpop.f32.mrb[5].mxu1  ;;  %v579_v20 = vadd.f32 %v874_v56, %v429_v32  ;;  %v454_v45 = vpop.permute.xlu0 %453 }
 0x1e8   :  { %v729_v62 = vadd.f32 %v714_v54, %v713_v52  ;;  %v875_v63 = vpop.f32.mrb[6].mxu1  ;;  %v571_v9 = vadd.f32 %v570_v58, %v419_v28 }
 0x1e9   :  { %v573_v1 = vpop.f32.mrb[7].mxu1  ;;  %v582_v35 = vadd.f32 %v875_v63, %v434_v34  ;;  %v611_v28 = vmax.f32 %v579_v20, 0.0  ;;  %v757_v63 = vshrl.u32 %v756_v60, 7 }
 0x1ea   :  { %v730_v4 = vadd.f32 %v729_v62, %v715_v59  ;;  %v574_v14 = vadd.f32 %v573_v1, %v424_v30  ;;  %v609_v21 = vmax.f32 %v571_v9, 0.0  ;;  %v701_v49 = vpop.permute.xlu1 %700 }
 0x1eb   :  { %v612_v40 = vmax.f32 %v582_v35, 0.0  ;;  %v723_v29 = vmul.f32 %v686_v0, %v611_v28  ;;  %v706_v55 = vpop.permute.xlu0 %705 }
 0x1ec   :  { %v731_v8 = vadd.f32 %v730_v4, %v716_v2  ;;  %v610_v25 = vmax.f32 %v574_v14, 0.0  ;;  %v721_v37 = vmul.f32 %v676_v33, %v609_v21  ;;  %v758_v2 = vsub.s32 0, %v757_v63 }
 0x1ed   :  { %v724_v46 = vmul.f32 %v691_v16, %v612_v40 }
 0x1ee   :  { %v732_v13 = vadd.f32 %v731_v8, %v717_v7  ;;  %v878_v15 = vpop.f32.mrb[8].mxu1  ;;  %v722_v41 = vmul.f32 %v681_v48, %v610_v25 }
 0x1ef   :  { %v586_v17 = vpop.f32.mrb[9].mxu1  ;;  %v595_v32 = vadd.f32 %v878_v15, %v449_v36  ;;  %v754_v4 = vpop.permute.xlu0 %753 }
 0x1f0   :  { %v733_v19 = vadd.f32 %v732_v13, %v718_v12  ;;  %v879_v22 = vpop.f32.mrb[10].mxu1  ;;  %v587_v27 = vadd.f32 %v586_v17, %v439_v57  ;;  %v711_v57 = vpop.permute.xlu1 %710  ;;  %v759_v6 = vrot.slane %v754_v4, %v758_v2 }
 0x1f1   :  { %v589_v23 = vpop.f32.mrb[11].mxu1  ;;  %v598_v47 = vadd.f32 %v879_v22, %v454_v45  ;;  %v615_v50 = vmax.f32 %v595_v32, 0.0 }
 0x1f2   :  { %v734_v26 = vadd.f32 %v733_v19, %v719_v18  ;;  %v590_v42 = vadd.f32 %v589_v23, %v444_v10  ;;  %v613_v44 = vmax.f32 %v587_v27, 0.0 }
 0x1f3   :  { %v616_v53 = vmax.f32 %v598_v47, 0.0  ;;  %v727_v56 = vmul.f32 %v706_v55, %v615_v50 }
 0x1f4   :  { %v735_v38 = vadd.f32 %v734_v26, %v720_v24  ;;  %v614_v34 = vmax.f32 %v590_v42, 0.0  ;;  %v725_v51 = vmul.f32 %v696_v39, %v613_v44 }
 0x1f5   :  { %v728_v58 = vmul.f32 %v711_v57, %v616_v53 }
 0x1f6   :  { %v736_v30 = vadd.f32 %v735_v38, %v721_v37  ;;  %v726_v54 = vmul.f32 %v701_v49, %v614_v34 }
 0x1f8   :  { %v737_v43 = vadd.f32 %v736_v30, %v722_v41 }
 0x1fa   :  { %v738_v31 = vadd.f32 %v737_v43, %v723_v29 }
 0x1fc   :  { %v739_v33 = vadd.f32 %v738_v31, %v724_v46 }
 0x1fe   :  { %v740_v52 = vadd.f32 %v739_v33, %v725_v51 }
 0x200   :  { %v741_v48 = vadd.f32 %v740_v52, %v726_v54 }
 0x202   :  { %v742_v59 = vadd.f32 %v741_v48, %v727_v56 }
 0x204   :  { %v743_v61 = vadd.f32 %v742_v59, %v728_v58 }
 0x206   :  { %v744_v62 = vrot.slane %v743_v61, 4 }
 0x208   :  { %v745_v0 = vadd.f32 %v744_v62, %v743_v61 }
 0x20a   :  { %v746_v1 = vrot.slane %v745_v0, 2 }
 0x20c   :  { %v747_v3 = vadd.f32 %v746_v1, %v745_v0 }
 0x20e   :  { %v748_v5 = vrot.slane %v747_v3, 1 }
 0x210   :  { %v749_v7 = vadd.f32 %v748_v5, %v747_v3 }
 0x212   :  { %v760_v8 = vadd.f32 %v759_v6, %v749_v7 }
 0x214   :  { %761 = vst [vmem:[#allocation3] sm:$0x1] %v760_v8 }
 0x215   :  { %930 = shalt.err (!%p927_p4)
}
 0x216   :  { %s931_s30 = scalar_lea.hbm %s1213_s7, 16 }
 0x217   :  { %p932_p5 = scmp.ne.s32.totalorder %s1213_s7, %s931_s30  ;;  %p935_p6 = scmp.lt.u32.totalorder %s931_s30, %s1213_s7 }
 0x219   :  { %p937_p7 = pnand %p935_p6, %p932_p5 }
 0x21b   :  { %940 = shalt.err (!%p937_p7)
}
 0x21c   :  { %771 = dma.vmem_to_hbm [thread:$0]  %s769_s25, 16, %s1213_s7, [#allocation4]  }
 0x21d   :  { %941 = dma.done.wait [#allocation4], 16  }
 0x21e   :  { %942 = vsyncadd [#allocation4], 4294967280 }
 0x21f   :  { %775 = vsyncpa [#allocation4], 1 }

</bundles_post_ra>
